<compile_context>
chip_gen: v5e
topology: v5e:2x2
jax: 0.10.0
libtpu: 0.0.40
codegen_flags: <defaults>
</compile_context>

<pallas_src>
import functools
import math

import jax
import jax.numpy as jnp
import numpy as np
from jax import lax
from jax.experimental import pallas as pl
from jax.experimental.pallas import tpu as pltpu


_MAX_STATIC_T = 32   # beyond this, use fori_loop (vreg-pressure / IMEM guard)
_NEG_BIG = -1e30     # guard for all -inf rows (keeps exp/log NaN-free)


def _rows(x):
    """Split a (K, N) block into K (1, N) sublane rows (static slices)."""
    return [x[i:i + 1, :] for i in range(x.shape[0])]


def _tree(rows, op):
    """Pairwise (log2 K deep) reduction of (1, N) rows -> (1, N); pure VPU."""
    while len(rows) > 1:
        nxt = [op(rows[j], rows[j + 1]) for j in range(0, len(rows) - 1, 2)]
        if len(rows) % 2:
            nxt.append(rows[-1])
        rows = nxt
    return rows[0]


def hmm_forward_kernel(x_ref, p_ref, out_ref, *, K, N, T, D):
    # x_ref:   (D, T*N)      observations, time-major columns (col = t*N + n)
    # p_ref:   (K, 2D+K+2)   packed per-state params:
    #            [:, :2D]       fused emission weights [-0.5*prec | mu*prec]
    #            [:, 2D:2D+K]   A^T (row-softmax transition, transposed)
    #            [:, 2D+K]      per-state log-normalizer constant
    #            [:, 2D+K+1]    log-softmax state prior
    # out_ref: (1, 1)        sum over subjects of final log-likelihood
    x = x_ref[...]                                                    # (D, T*N)
    params = p_ref[...]                                               # (K, 2D+K+2)

    o_a, o_c, o_p = 2 * D, 2 * D + K, 2 * D + K + 1
    w = params[:, 0:o_a]                                              # (K, 2D)
    a_t = params[:, o_a:o_c]                                          # (K, K): a_t[j,i] = A[i,j]
    const = params[:, o_c:o_c + 1]                                    # (K, 1)
    log_pi = params[:, o_p:o_p + 1]                                   # (K, 1)

    # ---- Emission log-likelihoods, transposed: one MXU matmul -> (K, T*N) ----
    #   em[k, col] = -0.5*sum_d prec[k,d]*x_d^2 + sum_d mu[k,d]*prec[k,d]*x_d + const[k]
    lhs = jnp.concatenate([x * x, x], axis=0)                         # (2D, T*N)
    em = jnp.dot(w, lhs, preferred_element_type=jnp.float32) + const  # (K, T*N)

    # Hoisted out of the time loop (JAX does not CSE broadcast_in_dim):
    # a_cols[i][j, n] = A[i, j], broadcast over the lane axis.
    a_cols = [jnp.broadcast_to(a_t[:, i:i + 1], (K, N)) for i in range(K)]

    def emit_static(t):
        # Contiguous static lane slice; 128-aligned whenever N % 128 == 0.
        return em[:, t * N:(t + 1) * N]                               # (K, N)

    def emit_dyn(t):
        return lax.dynamic_slice_in_dim(em, t * N, N, axis=1)         # (K, N)

    def step(log_alpha, em_t):
        # log_alpha[j,n] <- em_t[j,n] + log( sum_i exp(log_alpha[i,n]) * A[i,j] )
        m = jnp.maximum(_tree(_rows(log_alpha), jnp.maximum), _NEG_BIG)  # (1, N)
        p = jnp.exp(log_alpha - m)                                       # (K, N)
        p_rows = _rows(p)
        s = a_cols[0] * p_rows[0]                                        # (K, N)
        for i in range(1, K):                                            # K-unrolled VPU FMAs
            s = s + a_cols[i] * p_rows[i]
        return em_t + m + jnp.log(s)

    # ---- Forward recursion ----
    log_alpha = log_pi + emit_static(0)                                  # (K, N)
    if T <= _MAX_STATIC_T:
        for t in range(1, T):                                            # static unroll
            log_alpha = step(log_alpha, emit_static(t))
    else:
        log_alpha = lax.fori_loop(
            1, T, lambda t, la: step(la, emit_dyn(t)), log_alpha, unroll=4)

    # ---- logsumexp over states (sublane tree), then sum over subjects ----
    m2 = jnp.maximum(_tree(_rows(log_alpha), jnp.maximum), _NEG_BIG)     # (1, N)
    ssum = _tree(_rows(jnp.exp(log_alpha - m2)), lambda a, b: a + b)     # (1, N)
    ll = m2 + jnp.log(ssum)                                              # (1, N)
    # Single cross-lane reduce, once, at the very end.
    out_ref[...] = jnp.sum(ll, axis=1, keepdims=True)                    # (1, 1)


@jax.jit
def hmm_forward(X, state_priors, transition_matrix, mu, log_var):
    """Pallas HMM forward pass. X: (N, T, D) float32. Returns scalar log-prob."""
    N, T, D = X.shape
    K = state_priors.shape[0]

    # ---- Parameter normalization / fusion (tiny, fused under the same jit) ----
    a_t = jnp.transpose(jax.nn.softmax(transition_matrix, axis=1))       # (K, K)
    log_pi = jax.nn.log_softmax(state_priors, axis=0)[:, None]           # (K, 1)
    prec = jnp.exp(-log_var)                                             # (K, D)
    w = jnp.concatenate([-0.5 * prec, mu * prec], axis=1)                # (K, 2D)
    const = (-0.5 * (jnp.sum(mu * mu * prec, axis=1)
                     + jnp.sum(log_var, axis=1)
                     + D * math.log(2.0 * math.pi)))[:, None]            # (K, 1)
    # Pack all per-state parameters into ONE array -> a single parameter DMA.
    params = jnp.concatenate([w, a_t, const, log_pi], axis=1).astype(jnp.float32)

    # Observations transposed to (D, T*N), time-major columns, so the emission
    # table comes out (K, T*N) with batch/time on the lane axis.
    x_t = jnp.transpose(X, (2, 1, 0)).reshape(D, T * N).astype(jnp.float32)
    # TODO(synk): at large N, grid over N tiles (dimension_semantics=("parallel",))
    # with >=512-column lane tiles on v6e (raise vmem_limit_bytes) and about half
    # that on v7x (64 MiB VMEM / TC, 2 TCs); on v7x also pass x_t / w as bf16
    # (f32 accumulation via preferred_element_type) to halve the dominant HBM
    # read stream; keep everything f32 on v5e (no bf16 VPU path).

    kernel = functools.partial(hmm_forward_kernel, K=K, N=N, T=T, D=D)
    out = pl.pallas_call(
        kernel,
        out_shape=jax.ShapeDtypeStruct((1, 1), jnp.float32),
        in_specs=[pl.BlockSpec(memory_space=pltpu.MemorySpace.VMEM)] * 2,
        out_specs=pl.BlockSpec(memory_space=pltpu.MemorySpace.VMEM),
    )(x_t, params)
    return out[0, 0]


def hmm_forward_ref(X, state_priors, transition_matrix, mu, log_var):
    """Pure-JAX mirror of HiddenMarkovModel.forward (diag-Gaussian emissions)."""
    N, T, Dobs = X.shape
    log_A = jax.nn.log_softmax(transition_matrix, axis=1)
    log_pi = jax.nn.log_softmax(state_priors, axis=0)
    var = jnp.exp(log_var)
    diff = X[None, :, :, :] - mu[:, None, None, :]                       # (K, N, T, D)
    ll = -0.5 * (jnp.sum(diff * diff / var[:, None, None, :], axis=-1)
                 + jnp.sum(log_var, axis=1)[:, None, None]
                 + Dobs * jnp.log(2.0 * jnp.pi))                         # (K, N, T)
    emissions = jnp.transpose(ll, (0, 2, 1))                             # (K, T, N)
    log_alpha = log_pi[None, :] + emissions[:, 0, :].T                   # (N, K)
    for t in range(1, T):
        log_alpha = emissions[:, t, :].T + jax.scipy.special.logsumexp(
            log_alpha[:, :, None] + log_A[None, :, :], axis=1)
    log_props = jax.scipy.special.logsumexp(log_alpha, axis=1)           # (N,)
    return jnp.sum(log_props)


if __name__ == "__main__":
    K = 4          # number of hidden states
    obs_dim = 16   # observation dimension
    N = 2          # batch (num subjects)
    T = 8          # observation sequence length

    key = jax.random.PRNGKey(0)
    k1, k2, k3, k4, k5 = jax.random.split(key, 5)

    # deterministic parameter init (mirrors torch.rand for pi / T)
    state_priors = jax.random.uniform(k1, (K,), dtype=jnp.float32)
    transition_matrix = jax.random.uniform(k2, (K, K), dtype=jnp.float32)
    # diag-Gaussian emission parameters per state
    mu = 0.5 * jax.random.normal(k3, (K, obs_dim), dtype=jnp.float32)
    log_var = 0.1 * jax.random.normal(k4, (K, obs_dim), dtype=jnp.float32)

    # input X: (batch, seq, obs_dim)
    X = jax.random.normal(k5, (N, T, obs_dim), dtype=jnp.float32)

    out = jax.block_until_ready(
        hmm_forward(X, state_priors, transition_matrix, mu, log_var))
    ref = jax.block_until_ready(
        hmm_forward_ref(X, state_priors, transition_matrix, mu, log_var))
    np.testing.assert_allclose(np.array(out), np.array(ref), rtol=1e-4, atol=1e-4)

    print("KERNEL_OK")
</pallas_src>

<mosaic_0001>
module attributes {stable_mosaic.version = 11 : i64} {
  func.func @hmm_forward_kernel(%arg0: memref<16x16xf32, #tpu.memory_space<vmem>>, %arg1: memref<4x38xf32, #tpu.memory_space<vmem>>, %arg2: memref<1x1xf32, #tpu.memory_space<vmem>>) attributes {dimension_semantics = [], scalar_prefetch = 0 : i64, scratch_operands = 0 : i64, tpu.core_type = #tpu.core_type<tc>} {
    %c0 = arith.constant 0 : index
    %c0_0 = arith.constant 0 : index
    %0 = vector.load %arg0[%c0, %c0_0] : memref<16x16xf32, #tpu.memory_space<vmem>>, vector<16x16xf32>
    %c0_1 = arith.constant 0 : index
    %c0_2 = arith.constant 0 : index
    %1 = vector.load %arg1[%c0_1, %c0_2] : memref<4x38xf32, #tpu.memory_space<vmem>>, vector<4x38xf32>
    %2 = vector.extract_strided_slice %1 {offsets = [0, 0], sizes = [4, 32], strides = [1, 1]} : vector<4x38xf32> to vector<4x32xf32>
    %3 = vector.extract_strided_slice %1 {offsets = [0, 32], sizes = [4, 4], strides = [1, 1]} : vector<4x38xf32> to vector<4x4xf32>
    %4 = vector.extract_strided_slice %1 {offsets = [0, 36], sizes = [4, 1], strides = [1, 1]} : vector<4x38xf32> to vector<4x1xf32>
    %5 = vector.extract_strided_slice %1 {offsets = [0, 37], sizes = [4, 1], strides = [1, 1]} : vector<4x38xf32> to vector<4x1xf32>
    %6 = arith.mulf %0, %0 : vector<16x16xf32>
    %7 = tpu.concatenate %6, %0 in 0 : vector<16x16xf32>, vector<16x16xf32> -> vector<32x16xf32>
    %cst = arith.constant dense<0.000000e+00> : vector<4x16xf32>
    %8 = tpu.matmul %2, %7, %cst {dimension_numbers = #tpu.dot_dimension_numbers<[1], [0], [0], [1], [0, 0, 1, 1], [], []>} : vector<4x32xf32>, vector<32x16xf32>, vector<4x16xf32> -> vector<4x16xf32>
    %9 = vector.broadcast %4 : vector<4x1xf32> to vector<4x16xf32>
    %10 = arith.addf %8, %9 : vector<4x16xf32>
    %11 = vector.extract_strided_slice %3 {offsets = [0, 0], sizes = [4, 1], strides = [1, 1]} : vector<4x4xf32> to vector<4x1xf32>
    %12 = vector.shape_cast %11 : vector<4x1xf32> to vector<4x1xf32>
    %13 = vector.broadcast %12 : vector<4x1xf32> to vector<4x2xf32>
    %14 = vector.extract_strided_slice %3 {offsets = [0, 1], sizes = [4, 1], strides = [1, 1]} : vector<4x4xf32> to vector<4x1xf32>
    %15 = vector.shape_cast %14 : vector<4x1xf32> to vector<4x1xf32>
    %16 = vector.broadcast %15 : vector<4x1xf32> to vector<4x2xf32>
    %17 = vector.extract_strided_slice %3 {offsets = [0, 2], sizes = [4, 1], strides = [1, 1]} : vector<4x4xf32> to vector<4x1xf32>
    %18 = vector.shape_cast %17 : vector<4x1xf32> to vector<4x1xf32>
    %19 = vector.broadcast %18 : vector<4x1xf32> to vector<4x2xf32>
    %20 = vector.extract_strided_slice %3 {offsets = [0, 3], sizes = [4, 1], strides = [1, 1]} : vector<4x4xf32> to vector<4x1xf32>
    %21 = vector.shape_cast %20 : vector<4x1xf32> to vector<4x1xf32>
    %22 = vector.broadcast %21 : vector<4x1xf32> to vector<4x2xf32>
    %23 = vector.extract_strided_slice %10 {offsets = [0, 0], sizes = [4, 2], strides = [1, 1]} : vector<4x16xf32> to vector<4x2xf32>
    %24 = vector.broadcast %5 : vector<4x1xf32> to vector<4x2xf32>
    %25 = arith.addf %24, %23 : vector<4x2xf32>
    %26 = vector.extract_strided_slice %10 {offsets = [0, 2], sizes = [4, 2], strides = [1, 1]} : vector<4x16xf32> to vector<4x2xf32>
    %27 = vector.extract_strided_slice %25 {offsets = [0, 0], sizes = [1, 2], strides = [1, 1]} : vector<4x2xf32> to vector<1x2xf32>
    %28 = vector.extract_strided_slice %25 {offsets = [1, 0], sizes = [1, 2], strides = [1, 1]} : vector<4x2xf32> to vector<1x2xf32>
    %29 = vector.extract_strided_slice %25 {offsets = [2, 0], sizes = [1, 2], strides = [1, 1]} : vector<4x2xf32> to vector<1x2xf32>
    %30 = vector.extract_strided_slice %25 {offsets = [3, 0], sizes = [1, 2], strides = [1, 1]} : vector<4x2xf32> to vector<1x2xf32>
    %31 = arith.maximumf %27, %28 : vector<1x2xf32>
    %32 = arith.maximumf %29, %30 : vector<1x2xf32>
    %33 = arith.maximumf %31, %32 : vector<1x2xf32>
    %cst_3 = arith.constant -1.000000e+30 : f32
    %34 = vector.broadcast %cst_3 : f32 to vector<1x2xf32>
    %35 = arith.maximumf %33, %34 : vector<1x2xf32>
    %36 = vector.broadcast %35 : vector<1x2xf32> to vector<4x2xf32>
    %37 = arith.subf %25, %36 : vector<4x2xf32>
    %38 = math.exp %37 : vector<4x2xf32>
    %39 = vector.extract_strided_slice %38 {offsets = [0, 0], sizes = [1, 2], strides = [1, 1]} : vector<4x2xf32> to vector<1x2xf32>
    %40 = vector.extract_strided_slice %38 {offsets = [1, 0], sizes = [1, 2], strides = [1, 1]} : vector<4x2xf32> to vector<1x2xf32>
    %41 = vector.extract_strided_slice %38 {offsets = [2, 0], sizes = [1, 2], strides = [1, 1]} : vector<4x2xf32> to vector<1x2xf32>
    %42 = vector.extract_strided_slice %38 {offsets = [3, 0], sizes = [1, 2], strides = [1, 1]} : vector<4x2xf32> to vector<1x2xf32>
    %43 = vector.broadcast %39 : vector<1x2xf32> to vector<4x2xf32>
    %44 = arith.mulf %13, %43 : vector<4x2xf32>
    %45 = vector.broadcast %40 : vector<1x2xf32> to vector<4x2xf32>
    %46 = arith.mulf %16, %45 : vector<4x2xf32>
    %47 = arith.addf %44, %46 : vector<4x2xf32>
    %48 = vector.broadcast %41 : vector<1x2xf32> to vector<4x2xf32>
    %49 = arith.mulf %19, %48 : vector<4x2xf32>
    %50 = arith.addf %47, %49 : vector<4x2xf32>
    %51 = vector.broadcast %42 : vector<1x2xf32> to vector<4x2xf32>
    %52 = arith.mulf %22, %51 : vector<4x2xf32>
    %53 = arith.addf %50, %52 : vector<4x2xf32>
    %54 = vector.broadcast %35 : vector<1x2xf32> to vector<4x2xf32>
    %55 = arith.addf %26, %54 : vector<4x2xf32>
    %56 = math.log %53 : vector<4x2xf32>
    %57 = arith.addf %55, %56 : vector<4x2xf32>
    %58 = vector.extract_strided_slice %10 {offsets = [0, 4], sizes = [4, 2], strides = [1, 1]} : vector<4x16xf32> to vector<4x2xf32>
    %59 = vector.extract_strided_slice %57 {offsets = [0, 0], sizes = [1, 2], strides = [1, 1]} : vector<4x2xf32> to vector<1x2xf32>
    %60 = vector.extract_strided_slice %57 {offsets = [1, 0], sizes = [1, 2], strides = [1, 1]} : vector<4x2xf32> to vector<1x2xf32>
    %61 = vector.extract_strided_slice %57 {offsets = [2, 0], sizes = [1, 2], strides = [1, 1]} : vector<4x2xf32> to vector<1x2xf32>
    %62 = vector.extract_strided_slice %57 {offsets = [3, 0], sizes = [1, 2], strides = [1, 1]} : vector<4x2xf32> to vector<1x2xf32>
    %63 = arith.maximumf %59, %60 : vector<1x2xf32>
    %64 = arith.maximumf %61, %62 : vector<1x2xf32>
    %65 = arith.maximumf %63, %64 : vector<1x2xf32>
    %cst_4 = arith.constant -1.000000e+30 : f32
    %66 = vector.broadcast %cst_4 : f32 to vector<1x2xf32>
    %67 = arith.maximumf %65, %66 : vector<1x2xf32>
    %68 = vector.broadcast %67 : vector<1x2xf32> to vector<4x2xf32>
    %69 = arith.subf %57, %68 : vector<4x2xf32>
    %70 = math.exp %69 : vector<4x2xf32>
    %71 = vector.extract_strided_slice %70 {offsets = [0, 0], sizes = [1, 2], strides = [1, 1]} : vector<4x2xf32> to vector<1x2xf32>
    %72 = vector.extract_strided_slice %70 {offsets = [1, 0], sizes = [1, 2], strides = [1, 1]} : vector<4x2xf32> to vector<1x2xf32>
    %73 = vector.extract_strided_slice %70 {offsets = [2, 0], sizes = [1, 2], strides = [1, 1]} : vector<4x2xf32> to vector<1x2xf32>
    %74 = vector.extract_strided_slice %70 {offsets = [3, 0], sizes = [1, 2], strides = [1, 1]} : vector<4x2xf32> to vector<1x2xf32>
    %75 = vector.broadcast %71 : vector<1x2xf32> to vector<4x2xf32>
    %76 = arith.mulf %13, %75 : vector<4x2xf32>
    %77 = vector.broadcast %72 : vector<1x2xf32> to vector<4x2xf32>
    %78 = arith.mulf %16, %77 : vector<4x2xf32>
    %79 = arith.addf %76, %78 : vector<4x2xf32>
    %80 = vector.broadcast %73 : vector<1x2xf32> to vector<4x2xf32>
    %81 = arith.mulf %19, %80 : vector<4x2xf32>
    %82 = arith.addf %79, %81 : vector<4x2xf32>
    %83 = vector.broadcast %74 : vector<1x2xf32> to vector<4x2xf32>
    %84 = arith.mulf %22, %83 : vector<4x2xf32>
    %85 = arith.addf %82, %84 : vector<4x2xf32>
    %86 = vector.broadcast %67 : vector<1x2xf32> to vector<4x2xf32>
    %87 = arith.addf %58, %86 : vector<4x2xf32>
    %88 = math.log %85 : vector<4x2xf32>
    %89 = arith.addf %87, %88 : vector<4x2xf32>
    %90 = vector.extract_strided_slice %10 {offsets = [0, 6], sizes = [4, 2], strides = [1, 1]} : vector<4x16xf32> to vector<4x2xf32>
    %91 = vector.extract_strided_slice %89 {offsets = [0, 0], sizes = [1, 2], strides = [1, 1]} : vector<4x2xf32> to vector<1x2xf32>
    %92 = vector.extract_strided_slice %89 {offsets = [1, 0], sizes = [1, 2], strides = [1, 1]} : vector<4x2xf32> to vector<1x2xf32>
    %93 = vector.extract_strided_slice %89 {offsets = [2, 0], sizes = [1, 2], strides = [1, 1]} : vector<4x2xf32> to vector<1x2xf32>
    %94 = vector.extract_strided_slice %89 {offsets = [3, 0], sizes = [1, 2], strides = [1, 1]} : vector<4x2xf32> to vector<1x2xf32>
    %95 = arith.maximumf %91, %92 : vector<1x2xf32>
    %96 = arith.maximumf %93, %94 : vector<1x2xf32>
    %97 = arith.maximumf %95, %96 : vector<1x2xf32>
    %cst_5 = arith.constant -1.000000e+30 : f32
    %98 = vector.broadcast %cst_5 : f32 to vector<1x2xf32>
    %99 = arith.maximumf %97, %98 : vector<1x2xf32>
    %100 = vector.broadcast %99 : vector<1x2xf32> to vector<4x2xf32>
    %101 = arith.subf %89, %100 : vector<4x2xf32>
    %102 = math.exp %101 : vector<4x2xf32>
    %103 = vector.extract_strided_slice %102 {offsets = [0, 0], sizes = [1, 2], strides = [1, 1]} : vector<4x2xf32> to vector<1x2xf32>
    %104 = vector.extract_strided_slice %102 {offsets = [1, 0], sizes = [1, 2], strides = [1, 1]} : vector<4x2xf32> to vector<1x2xf32>
    %105 = vector.extract_strided_slice %102 {offsets = [2, 0], sizes = [1, 2], strides = [1, 1]} : vector<4x2xf32> to vector<1x2xf32>
    %106 = vector.extract_strided_slice %102 {offsets = [3, 0], sizes = [1, 2], strides = [1, 1]} : vector<4x2xf32> to vector<1x2xf32>
    %107 = vector.broadcast %103 : vector<1x2xf32> to vector<4x2xf32>
    %108 = arith.mulf %13, %107 : vector<4x2xf32>
    %109 = vector.broadcast %104 : vector<1x2xf32> to vector<4x2xf32>
    %110 = arith.mulf %16, %109 : vector<4x2xf32>
    %111 = arith.addf %108, %110 : vector<4x2xf32>
    %112 = vector.broadcast %105 : vector<1x2xf32> to vector<4x2xf32>
    %113 = arith.mulf %19, %112 : vector<4x2xf32>
    %114 = arith.addf %111, %113 : vector<4x2xf32>
    %115 = vector.broadcast %106 : vector<1x2xf32> to vector<4x2xf32>
    %116 = arith.mulf %22, %115 : vector<4x2xf32>
    %117 = arith.addf %114, %116 : vector<4x2xf32>
    %118 = vector.broadcast %99 : vector<1x2xf32> to vector<4x2xf32>
    %119 = arith.addf %90, %118 : vector<4x2xf32>
    %120 = math.log %117 : vector<4x2xf32>
    %121 = arith.addf %119, %120 : vector<4x2xf32>
    %122 = vector.extract_strided_slice %10 {offsets = [0, 8], sizes = [4, 2], strides = [1, 1]} : vector<4x16xf32> to vector<4x2xf32>
    %123 = vector.extract_strided_slice %121 {offsets = [0, 0], sizes = [1, 2], strides = [1, 1]} : vector<4x2xf32> to vector<1x2xf32>
    %124 = vector.extract_strided_slice %121 {offsets = [1, 0], sizes = [1, 2], strides = [1, 1]} : vector<4x2xf32> to vector<1x2xf32>
    %125 = vector.extract_strided_slice %121 {offsets = [2, 0], sizes = [1, 2], strides = [1, 1]} : vector<4x2xf32> to vector<1x2xf32>
    %126 = vector.extract_strided_slice %121 {offsets = [3, 0], sizes = [1, 2], strides = [1, 1]} : vector<4x2xf32> to vector<1x2xf32>
    %127 = arith.maximumf %123, %124 : vector<1x2xf32>
    %128 = arith.maximumf %125, %126 : vector<1x2xf32>
    %129 = arith.maximumf %127, %128 : vector<1x2xf32>
    %cst_6 = arith.constant -1.000000e+30 : f32
    %130 = vector.broadcast %cst_6 : f32 to vector<1x2xf32>
    %131 = arith.maximumf %129, %130 : vector<1x2xf32>
    %132 = vector.broadcast %131 : vector<1x2xf32> to vector<4x2xf32>
    %133 = arith.subf %121, %132 : vector<4x2xf32>
    %134 = math.exp %133 : vector<4x2xf32>
    %135 = vector.extract_strided_slice %134 {offsets = [0, 0], sizes = [1, 2], strides = [1, 1]} : vector<4x2xf32> to vector<1x2xf32>
    %136 = vector.extract_strided_slice %134 {offsets = [1, 0], sizes = [1, 2], strides = [1, 1]} : vector<4x2xf32> to vector<1x2xf32>
    %137 = vector.extract_strided_slice %134 {offsets = [2, 0], sizes = [1, 2], strides = [1, 1]} : vector<4x2xf32> to vector<1x2xf32>
    %138 = vector.extract_strided_slice %134 {offsets = [3, 0], sizes = [1, 2], strides = [1, 1]} : vector<4x2xf32> to vector<1x2xf32>
    %139 = vector.broadcast %135 : vector<1x2xf32> to vector<4x2xf32>
    %140 = arith.mulf %13, %139 : vector<4x2xf32>
    %141 = vector.broadcast %136 : vector<1x2xf32> to vector<4x2xf32>
    %142 = arith.mulf %16, %141 : vector<4x2xf32>
    %143 = arith.addf %140, %142 : vector<4x2xf32>
    %144 = vector.broadcast %137 : vector<1x2xf32> to vector<4x2xf32>
    %145 = arith.mulf %19, %144 : vector<4x2xf32>
    %146 = arith.addf %143, %145 : vector<4x2xf32>
    %147 = vector.broadcast %138 : vector<1x2xf32> to vector<4x2xf32>
    %148 = arith.mulf %22, %147 : vector<4x2xf32>
    %149 = arith.addf %146, %148 : vector<4x2xf32>
    %150 = vector.broadcast %131 : vector<1x2xf32> to vector<4x2xf32>
    %151 = arith.addf %122, %150 : vector<4x2xf32>
    %152 = math.log %149 : vector<4x2xf32>
    %153 = arith.addf %151, %152 : vector<4x2xf32>
    %154 = vector.extract_strided_slice %10 {offsets = [0, 10], sizes = [4, 2], strides = [1, 1]} : vector<4x16xf32> to vector<4x2xf32>
    %155 = vector.extract_strided_slice %153 {offsets = [0, 0], sizes = [1, 2], strides = [1, 1]} : vector<4x2xf32> to vector<1x2xf32>
    %156 = vector.extract_strided_slice %153 {offsets = [1, 0], sizes = [1, 2], strides = [1, 1]} : vector<4x2xf32> to vector<1x2xf32>
    %157 = vector.extract_strided_slice %153 {offsets = [2, 0], sizes = [1, 2], strides = [1, 1]} : vector<4x2xf32> to vector<1x2xf32>
    %158 = vector.extract_strided_slice %153 {offsets = [3, 0], sizes = [1, 2], strides = [1, 1]} : vector<4x2xf32> to vector<1x2xf32>
    %159 = arith.maximumf %155, %156 : vector<1x2xf32>
    %160 = arith.maximumf %157, %158 : vector<1x2xf32>
    %161 = arith.maximumf %159, %160 : vector<1x2xf32>
    %cst_7 = arith.constant -1.000000e+30 : f32
    %162 = vector.broadcast %cst_7 : f32 to vector<1x2xf32>
    %163 = arith.maximumf %161, %162 : vector<1x2xf32>
    %164 = vector.broadcast %163 : vector<1x2xf32> to vector<4x2xf32>
    %165 = arith.subf %153, %164 : vector<4x2xf32>
    %166 = math.exp %165 : vector<4x2xf32>
    %167 = vector.extract_strided_slice %166 {offsets = [0, 0], sizes = [1, 2], strides = [1, 1]} : vector<4x2xf32> to vector<1x2xf32>
    %168 = vector.extract_strided_slice %166 {offsets = [1, 0], sizes = [1, 2], strides = [1, 1]} : vector<4x2xf32> to vector<1x2xf32>
    %169 = vector.extract_strided_slice %166 {offsets = [2, 0], sizes = [1, 2], strides = [1, 1]} : vector<4x2xf32> to vector<1x2xf32>
    %170 = vector.extract_strided_slice %166 {offsets = [3, 0], sizes = [1, 2], strides = [1, 1]} : vector<4x2xf32> to vector<1x2xf32>
    %171 = vector.broadcast %167 : vector<1x2xf32> to vector<4x2xf32>
    %172 = arith.mulf %13, %171 : vector<4x2xf32>
    %173 = vector.broadcast %168 : vector<1x2xf32> to vector<4x2xf32>
    %174 = arith.mulf %16, %173 : vector<4x2xf32>
    %175 = arith.addf %172, %174 : vector<4x2xf32>
    %176 = vector.broadcast %169 : vector<1x2xf32> to vector<4x2xf32>
    %177 = arith.mulf %19, %176 : vector<4x2xf32>
    %178 = arith.addf %175, %177 : vector<4x2xf32>
    %179 = vector.broadcast %170 : vector<1x2xf32> to vector<4x2xf32>
    %180 = arith.mulf %22, %179 : vector<4x2xf32>
    %181 = arith.addf %178, %180 : vector<4x2xf32>
    %182 = vector.broadcast %163 : vector<1x2xf32> to vector<4x2xf32>
    %183 = arith.addf %154, %182 : vector<4x2xf32>
    %184 = math.log %181 : vector<4x2xf32>
    %185 = arith.addf %183, %184 : vector<4x2xf32>
    %186 = vector.extract_strided_slice %10 {offsets = [0, 12], sizes = [4, 2], strides = [1, 1]} : vector<4x16xf32> to vector<4x2xf32>
    %187 = vector.extract_strided_slice %185 {offsets = [0, 0], sizes = [1, 2], strides = [1, 1]} : vector<4x2xf32> to vector<1x2xf32>
    %188 = vector.extract_strided_slice %185 {offsets = [1, 0], sizes = [1, 2], strides = [1, 1]} : vector<4x2xf32> to vector<1x2xf32>
    %189 = vector.extract_strided_slice %185 {offsets = [2, 0], sizes = [1, 2], strides = [1, 1]} : vector<4x2xf32> to vector<1x2xf32>
    %190 = vector.extract_strided_slice %185 {offsets = [3, 0], sizes = [1, 2], strides = [1, 1]} : vector<4x2xf32> to vector<1x2xf32>
    %191 = arith.maximumf %187, %188 : vector<1x2xf32>
    %192 = arith.maximumf %189, %190 : vector<1x2xf32>
    %193 = arith.maximumf %191, %192 : vector<1x2xf32>
    %cst_8 = arith.constant -1.000000e+30 : f32
    %194 = vector.broadcast %cst_8 : f32 to vector<1x2xf32>
    %195 = arith.maximumf %193, %194 : vector<1x2xf32>
    %196 = vector.broadcast %195 : vector<1x2xf32> to vector<4x2xf32>
    %197 = arith.subf %185, %196 : vector<4x2xf32>
    %198 = math.exp %197 : vector<4x2xf32>
    %199 = vector.extract_strided_slice %198 {offsets = [0, 0], sizes = [1, 2], strides = [1, 1]} : vector<4x2xf32> to vector<1x2xf32>
    %200 = vector.extract_strided_slice %198 {offsets = [1, 0], sizes = [1, 2], strides = [1, 1]} : vector<4x2xf32> to vector<1x2xf32>
    %201 = vector.extract_strided_slice %198 {offsets = [2, 0], sizes = [1, 2], strides = [1, 1]} : vector<4x2xf32> to vector<1x2xf32>
    %202 = vector.extract_strided_slice %198 {offsets = [3, 0], sizes = [1, 2], strides = [1, 1]} : vector<4x2xf32> to vector<1x2xf32>
    %203 = vector.broadcast %199 : vector<1x2xf32> to vector<4x2xf32>
    %204 = arith.mulf %13, %203 : vector<4x2xf32>
    %205 = vector.broadcast %200 : vector<1x2xf32> to vector<4x2xf32>
    %206 = arith.mulf %16, %205 : vector<4x2xf32>
    %207 = arith.addf %204, %206 : vector<4x2xf32>
    %208 = vector.broadcast %201 : vector<1x2xf32> to vector<4x2xf32>
    %209 = arith.mulf %19, %208 : vector<4x2xf32>
    %210 = arith.addf %207, %209 : vector<4x2xf32>
    %211 = vector.broadcast %202 : vector<1x2xf32> to vector<4x2xf32>
    %212 = arith.mulf %22, %211 : vector<4x2xf32>
    %213 = arith.addf %210, %212 : vector<4x2xf32>
    %214 = vector.broadcast %195 : vector<1x2xf32> to vector<4x2xf32>
    %215 = arith.addf %186, %214 : vector<4x2xf32>
    %216 = math.log %213 : vector<4x2xf32>
    %217 = arith.addf %215, %216 : vector<4x2xf32>
    %218 = vector.extract_strided_slice %10 {offsets = [0, 14], sizes = [4, 2], strides = [1, 1]} : vector<4x16xf32> to vector<4x2xf32>
    %219 = vector.extract_strided_slice %217 {offsets = [0, 0], sizes = [1, 2], strides = [1, 1]} : vector<4x2xf32> to vector<1x2xf32>
    %220 = vector.extract_strided_slice %217 {offsets = [1, 0], sizes = [1, 2], strides = [1, 1]} : vector<4x2xf32> to vector<1x2xf32>
    %221 = vector.extract_strided_slice %217 {offsets = [2, 0], sizes = [1, 2], strides = [1, 1]} : vector<4x2xf32> to vector<1x2xf32>
    %222 = vector.extract_strided_slice %217 {offsets = [3, 0], sizes = [1, 2], strides = [1, 1]} : vector<4x2xf32> to vector<1x2xf32>
    %223 = arith.maximumf %219, %220 : vector<1x2xf32>
    %224 = arith.maximumf %221, %222 : vector<1x2xf32>
    %225 = arith.maximumf %223, %224 : vector<1x2xf32>
    %cst_9 = arith.constant -1.000000e+30 : f32
    %226 = vector.broadcast %cst_9 : f32 to vector<1x2xf32>
    %227 = arith.maximumf %225, %226 : vector<1x2xf32>
    %228 = vector.broadcast %227 : vector<1x2xf32> to vector<4x2xf32>
    %229 = arith.subf %217, %228 : vector<4x2xf32>
    %230 = math.exp %229 : vector<4x2xf32>
    %231 = vector.extract_strided_slice %230 {offsets = [0, 0], sizes = [1, 2], strides = [1, 1]} : vector<4x2xf32> to vector<1x2xf32>
    %232 = vector.extract_strided_slice %230 {offsets = [1, 0], sizes = [1, 2], strides = [1, 1]} : vector<4x2xf32> to vector<1x2xf32>
    %233 = vector.extract_strided_slice %230 {offsets = [2, 0], sizes = [1, 2], strides = [1, 1]} : vector<4x2xf32> to vector<1x2xf32>
    %234 = vector.extract_strided_slice %230 {offsets = [3, 0], sizes = [1, 2], strides = [1, 1]} : vector<4x2xf32> to vector<1x2xf32>
    %235 = vector.broadcast %231 : vector<1x2xf32> to vector<4x2xf32>
    %236 = arith.mulf %13, %235 : vector<4x2xf32>
    %237 = vector.broadcast %232 : vector<1x2xf32> to vector<4x2xf32>
    %238 = arith.mulf %16, %237 : vector<4x2xf32>
    %239 = arith.addf %236, %238 : vector<4x2xf32>
    %240 = vector.broadcast %233 : vector<1x2xf32> to vector<4x2xf32>
    %241 = arith.mulf %19, %240 : vector<4x2xf32>
    %242 = arith.addf %239, %241 : vector<4x2xf32>
    %243 = vector.broadcast %234 : vector<1x2xf32> to vector<4x2xf32>
    %244 = arith.mulf %22, %243 : vector<4x2xf32>
    %245 = arith.addf %242, %244 : vector<4x2xf32>
    %246 = vector.broadcast %227 : vector<1x2xf32> to vector<4x2xf32>
    %247 = arith.addf %218, %246 : vector<4x2xf32>
    %248 = math.log %245 : vector<4x2xf32>
    %249 = arith.addf %247, %248 : vector<4x2xf32>
    %250 = vector.extract_strided_slice %249 {offsets = [0, 0], sizes = [1, 2], strides = [1, 1]} : vector<4x2xf32> to vector<1x2xf32>
    %251 = vector.extract_strided_slice %249 {offsets = [1, 0], sizes = [1, 2], strides = [1, 1]} : vector<4x2xf32> to vector<1x2xf32>
    %252 = vector.extract_strided_slice %249 {offsets = [2, 0], sizes = [1, 2], strides = [1, 1]} : vector<4x2xf32> to vector<1x2xf32>
    %253 = vector.extract_strided_slice %249 {offsets = [3, 0], sizes = [1, 2], strides = [1, 1]} : vector<4x2xf32> to vector<1x2xf32>
    %254 = arith.maximumf %250, %251 : vector<1x2xf32>
    %255 = arith.maximumf %252, %253 : vector<1x2xf32>
    %256 = arith.maximumf %254, %255 : vector<1x2xf32>
    %cst_10 = arith.constant -1.000000e+30 : f32
    %257 = vector.broadcast %cst_10 : f32 to vector<1x2xf32>
    %258 = arith.maximumf %256, %257 : vector<1x2xf32>
    %259 = vector.broadcast %258 : vector<1x2xf32> to vector<4x2xf32>
    %260 = arith.subf %249, %259 : vector<4x2xf32>
    %261 = math.exp %260 : vector<4x2xf32>
    %262 = vector.extract_strided_slice %261 {offsets = [0, 0], sizes = [1, 2], strides = [1, 1]} : vector<4x2xf32> to vector<1x2xf32>
    %263 = vector.extract_strided_slice %261 {offsets = [1, 0], sizes = [1, 2], strides = [1, 1]} : vector<4x2xf32> to vector<1x2xf32>
    %264 = vector.extract_strided_slice %261 {offsets = [2, 0], sizes = [1, 2], strides = [1, 1]} : vector<4x2xf32> to vector<1x2xf32>
    %265 = vector.extract_strided_slice %261 {offsets = [3, 0], sizes = [1, 2], strides = [1, 1]} : vector<4x2xf32> to vector<1x2xf32>
    %266 = arith.addf %262, %263 : vector<1x2xf32>
    %267 = arith.addf %264, %265 : vector<1x2xf32>
    %268 = arith.addf %266, %267 : vector<1x2xf32>
    %269 = math.log %268 : vector<1x2xf32>
    %270 = arith.addf %258, %269 : vector<1x2xf32>
    %cst_11 = arith.constant dense<0.000000e+00> : vector<1xf32>
    %271 = vector.multi_reduction <add>, %270, %cst_11 [1] : vector<1x2xf32> to vector<1xf32>
    %272 = vector.shape_cast %271 : vector<1xf32> to vector<1x1xf32>
    %c0_12 = arith.constant 0 : index
    %c0_13 = arith.constant 0 : index
    %273 = vector.load %arg2[%c0_12, %c0_13] : memref<1x1xf32, #tpu.memory_space<vmem>>, vector<1x1xf32>
    tpu.vector_store %arg2[%c0_12, %c0_13], %272 {strides = array<i32>} : memref<1x1xf32, #tpu.memory_space<vmem>>, vector<1x1xf32>,
    return
  }
}

</mosaic_0001>

<bundles_post_ra>
// kernel: hmm_forward.1
= control target key start
LH: loop header
LB: loop body
LE: loop exit
PB: predicated region body
PF: predicated region fallthrough
CT: control target
= control target key end

     0   :  { %v442_v4 = vmov 36   ;;  %s538_s0 = inlined_call_operand.vmem [shape: f32[16,16], index: 0, kind: input, shape index: {}]   ;;  %s539_s1 = inlined_call_operand.vmem [shape: f32[4,38], index: 1, kind: input, shape index: {}]   ;;  %s540_s2 = inlined_call_operand.hbm [shape: f32[1,1], index: 2, kind: output, shape index: {}]  }
   0x1   :  { %v13_v0 = vld [vmem:[%s538_s0 + $0x8] sm:$0xff]  ;;  %v12_v1 = vld [vmem:[%s538_s0] sm:$0xff]  ;;  %378 = vset.pattern.permute.xlu0 %v442_v4 }
   0x2   :  { %37 = vmatpush.msra.mxu0 %v13_v0  ;;  %v16_v2 = vmul.f32 %v13_v0, %v13_v0  ;;  %v14_v3 = vld [vmem:[%s539_s1] sm:$0xf] }
   0x3   :  { %7 = vsyncpa [#allocation3], 0  ;;  %19 = vperm.xlu0 %378, %v14_v3   ;;  %v443_v5 = vmov 32   ;;  %v15_v6 = vmul.f32 %v12_v1, %v12_v1  ;;  %v444_v7 = vmov 34   ;;  %vm22_vm0 = vcmask 261120   ;;  %s448_s0 = smov 2  }
   0x4   :  { %380 = vset.pattern.permute.xlu1 %v443_v5  ;;  %38 = vmatpush.msra.mxu0 %v12_v1  ;;  %v445_v8 = vmov 37   ;;  %v446_v9 = vmov 33   ;;  %v447_v10 = vmov 35   ;;  %s449_s1 = smov 114   ;;  %vm346_vm1 = vcmask 8192   ;;  %s450_s15 = smov [#allocation2]  }
   0x5   :  { %46 = vperm.xlu1 %380, %v14_v3   ;;  %382 = vset.pattern.permute.xlu2 %v444_v7  ;;  %s357_s16 = sshll.u32 %s450_s15, 4  ;;  %s359_s19 = sshll.u32 %s540_s2, 4  ;;  %vm350_vm2 = vcmask 0   ;;  %s358_s16 = int_to_ptr.vmem [resolvable:$true] %s357_s16  ;;  %s360_s19 = int_to_ptr.hbm [resolvable:$true] %s359_s19 }
   0x6   :  { %39 = vmatpush.msra.mxu0 %v16_v2  ;;  %54 = vperm.xlu2 %382, %v14_v3  }
   0x8   :  { %40 = vmatpush.msra.mxu0 %v15_v6 }
   0x9   :  { %368 = vmatmul.msk.f32.vlgmr.msra.gmra.mxu0 %vm22_vm0, %v14_v3 }
   0xb   :  { %379 = vset.pattern.permute.xlu0 %v445_v8 }
   0xc   :  { %62 = vperm.xlu0 %379, %v14_v3  }
   0xd   :  { %381 = vset.pattern.permute.xlu1 %v446_v9 }
   0xe   :  { %50 = vperm.xlu1 %381, %v14_v3   ;;  %383 = vset.pattern.permute.xlu2 %v447_v10 }
   0xf   :  { %58 = vperm.xlu2 %383, %v14_v3  }
  0x60   :  { %v481_v25 = vpop.permute.xlu2 %54 }
  0x69   :  { %v487_v34 = vpop.permute.xlu2 %58 }
  0x75   :  { %v20_v11 = vpop.permute.xlu0 %19 }
  0x77   :  { %v479_v23 = vpop.permute.xlu1 %46 }
  0x7e   :  { %v63_v13 = vpop.permute.xlu0 %62 }
  0x80   :  { %v483_v27 = vpop.permute.xlu1 %50 }
  0x86   :  { %v42_v12 = vpop.f32.mrf.mxu0 }
  0x87   :  { %v475_v14 = vadd.f32 %v42_v12, %v20_v11 }
  0x89   :  { %v65_v15 = vadd.f32 %v63_v13, %v475_v14 }
  0x8b   :  { %v67_v16 = vrot.slane %v65_v15, 1 }
  0x8d   :  { %v69_v17 = vmax.f32 %v65_v15, %v67_v16 }
  0x8f   :  { %v71_v18 = vrot.slane %v69_v17, 2 }
  0x91   :  { %v73_v19 = vmax.f32 %v69_v17, %v71_v18 }
  0x93   :  { %v74_v20 = vmax.f32 %v73_v19, -1e+30 }
  0x95   :  { %v75_v21 = vperm.slane %v74_v20, 0 }
  0x97   :  { %91 = vrot.lane.b32.xlu1 %v75_v21, %s448_s0  ;;  %v76_v22 = vsub.f32 %v65_v15, %v75_v21 }
  0x99   :  { %v77_v24 = vmul.f32 1.442695, %v76_v22 }
  0x9b   :  { %384 = vpow2.f32 %v77_v24 }
  0xa1   :  { %v385_v26 = vpop.eup %384 }
  0xa2   :  { %v79_v28 = vperm.slane %v385_v26, 0  ;;  %v81_v29 = vperm.slane %v385_v26, 1  ;;  %v84_v30 = vperm.slane %v385_v26, 2  ;;  %v87_v33 = vperm.slane %v385_v26, 3 }
  0xa4   :  { %v80_v31 = vmul.f32 %v79_v28, %v479_v23  ;;  %v82_v32 = vmul.f32 %v81_v29, %v483_v27  ;;  %v85_v36 = vmul.f32 %v84_v30, %v481_v25  ;;  %v88_v38 = vmul.f32 %v87_v33, %v487_v34 }
  0xa6   :  { %v83_v35 = vadd.f32 %v82_v32, %v80_v31 }
  0xa8   :  { %v86_v37 = vadd.f32 %v85_v36, %v83_v35 }
  0xaa   :  { %v89_v39 = vadd.f32 %v88_v38, %v86_v37 }
  0xac   :  { %386 = vlog2.f32 %v89_v39 }
  0xb2   :  { %v387_v40 = vpop.eup %386 }
  0xb3   :  { %v96_v41 = vmul.f32 0.6931472, %v387_v40 }
  0xb5   :  { %98 = vrot.lane.b32.xlu2 %v96_v41, %s448_s0 }
 0x109   :  { %v92_v42 = vpop.permute.xlu1 %91 }
 0x10a   :  { %v94_v43 = vadd.f32 %v92_v42, %v475_v14 }
 0x10f   :  { %v99_v44 = vpop.permute.xlu2 %98 }
 0x110   :  { %v101_v45 = vadd.f32 %v99_v44, %v94_v43 }
 0x112   :  { %v103_v46 = vrot.slane %v101_v45, 1 }
 0x114   :  { %v105_v47 = vmax.f32 %v101_v45, %v103_v46 }
 0x116   :  { %v107_v48 = vrot.slane %v105_v47, 2 }
 0x118   :  { %v109_v49 = vmax.f32 %v105_v47, %v107_v48 }
 0x11a   :  { %v110_v50 = vmax.f32 %v109_v49, -1e+30 }
 0x11c   :  { %v111_v51 = vperm.slane %v110_v50, 0 }
 0x11e   :  { %127 = vrot.lane.b32.xlu0 %v111_v51, %s448_s0  ;;  %v112_v52 = vsub.f32 %v101_v45, %v111_v51 }
 0x120   :  { %v113_v53 = vmul.f32 1.442695, %v112_v52 }
 0x122   :  { %388 = vpow2.f32 %v113_v53 }
 0x128   :  { %v389_v54 = vpop.eup %388 }
 0x129   :  { %v115_v55 = vperm.slane %v389_v54, 0  ;;  %v117_v56 = vperm.slane %v389_v54, 1  ;;  %v120_v57 = vperm.slane %v389_v54, 2  ;;  %v123_v60 = vperm.slane %v389_v54, 3 }
 0x12b   :  { %v116_v58 = vmul.f32 %v115_v55, %v479_v23  ;;  %v118_v59 = vmul.f32 %v117_v56, %v483_v27  ;;  %v121_v62 = vmul.f32 %v120_v57, %v481_v25  ;;  %v124_v0 = vmul.f32 %v123_v60, %v487_v34 }
 0x12d   :  { %v119_v61 = vadd.f32 %v118_v59, %v116_v58 }
 0x12f   :  { %v122_v63 = vadd.f32 %v121_v62, %v119_v61 }
 0x131   :  { %v125_v1 = vadd.f32 %v124_v0, %v122_v63 }
 0x133   :  { %390 = vlog2.f32 %v125_v1 }
 0x139   :  { %v391_v2 = vpop.eup %390 }
 0x13a   :  { %v132_v3 = vmul.f32 0.6931472, %v391_v2 }
 0x13c   :  { %134 = vrot.lane.b32.xlu1 %v132_v3, %s448_s0 }
 0x190   :  { %v128_v4 = vpop.permute.xlu0 %127 }
 0x191   :  { %v130_v5 = vadd.f32 %v128_v4, %v475_v14 }
 0x1ae   :  { %v135_v6 = vpop.permute.xlu1 %134 }
 0x1af   :  { %v137_v7 = vadd.f32 %v135_v6, %v130_v5 }
 0x1b1   :  { %v139_v8 = vrot.slane %v137_v7, 1 }
 0x1b3   :  { %v141_v9 = vmax.f32 %v137_v7, %v139_v8 }
 0x1b5   :  { %v143_v10 = vrot.slane %v141_v9, 2 }
 0x1b7   :  { %v145_v11 = vmax.f32 %v141_v9, %v143_v10 }
 0x1b9   :  { %v146_v12 = vmax.f32 %v145_v11, -1e+30 }
 0x1bb   :  { %v147_v13 = vperm.slane %v146_v12, 0 }
 0x1bd   :  { %163 = vrot.lane.b32.xlu2 %v147_v13, %s448_s0  ;;  %v148_v15 = vsub.f32 %v137_v7, %v147_v13 }
 0x1bf   :  { %v149_v16 = vmul.f32 1.442695, %v148_v15 }
 0x1c1   :  { %392 = vpow2.f32 %v149_v16 }
 0x1c7   :  { %v393_v17 = vpop.eup %392 }
 0x1c8   :  { %v151_v18 = vperm.slane %v393_v17, 0  ;;  %v153_v19 = vperm.slane %v393_v17, 1  ;;  %v156_v20 = vperm.slane %v393_v17, 2  ;;  %v159_v24 = vperm.slane %v393_v17, 3 }
 0x1ca   :  { %v152_v21 = vmul.f32 %v151_v18, %v479_v23  ;;  %v154_v22 = vmul.f32 %v153_v19, %v483_v27  ;;  %v157_v28 = vmul.f32 %v156_v20, %v481_v25  ;;  %v160_v30 = vmul.f32 %v159_v24, %v487_v34 }
 0x1cc   :  { %v155_v26 = vadd.f32 %v154_v22, %v152_v21 }
 0x1ce   :  { %v158_v29 = vadd.f32 %v157_v28, %v155_v26 }
 0x1d0   :  { %v161_v31 = vadd.f32 %v160_v30, %v158_v29 }
 0x1d2   :  { %394 = vlog2.f32 %v161_v31 }
 0x1d8   :  { %v395_v32 = vpop.eup %394 }
 0x1d9   :  { %v168_v33 = vmul.f32 0.6931472, %v395_v32 }
 0x1db   :  { %170 = vrot.lane.b32.xlu0 %v168_v33, %s448_s0 }
 0x217   :  { %v164_v35 = vpop.permute.xlu2 %163 }
 0x218   :  { %v166_v36 = vadd.f32 %v164_v35, %v475_v14 }
 0x24d   :  { %v171_v37 = vpop.permute.xlu0 %170 }
 0x24e   :  { %v173_v38 = vadd.f32 %v171_v37, %v166_v36 }
 0x250   :  { %v175_v39 = vrot.slane %v173_v38, 1 }
 0x252   :  { %v177_v40 = vmax.f32 %v173_v38, %v175_v39 }
 0x254   :  { %v179_v41 = vrot.slane %v177_v40, 2 }
 0x256   :  { %v181_v42 = vmax.f32 %v177_v40, %v179_v41 }
 0x258   :  { %v182_v43 = vmax.f32 %v181_v42, -1e+30 }
 0x25a   :  { %v183_v44 = vperm.slane %v182_v43, 0 }
 0x25c   :  { %199 = vrot.lane.b32.xlu1 %v183_v44, %s448_s0  ;;  %v184_v45 = vsub.f32 %v173_v38, %v183_v44 }
 0x25e   :  { %v185_v46 = vmul.f32 1.442695, %v184_v45 }
 0x260   :  { %396 = vpow2.f32 %v185_v46 }
 0x266   :  { %v397_v47 = vpop.eup %396 }
 0x267   :  { %v187_v48 = vperm.slane %v397_v47, 0  ;;  %v189_v49 = vperm.slane %v397_v47, 1  ;;  %v192_v50 = vperm.slane %v397_v47, 2  ;;  %v195_v53 = vperm.slane %v397_v47, 3 }
 0x269   :  { %v188_v51 = vmul.f32 %v187_v48, %v479_v23  ;;  %v190_v52 = vmul.f32 %v189_v49, %v483_v27  ;;  %v193_v55 = vmul.f32 %v192_v50, %v481_v25  ;;  %v196_v57 = vmul.f32 %v195_v53, %v487_v34 }
 0x26b   :  { %v191_v54 = vadd.f32 %v190_v52, %v188_v51 }
 0x26d   :  { %v194_v56 = vadd.f32 %v193_v55, %v191_v54 }
 0x26f   :  { %v197_v58 = vadd.f32 %v196_v57, %v194_v56 }
 0x271   :  { %398 = vlog2.f32 %v197_v58 }
 0x277   :  { %v399_v59 = vpop.eup %398 }
 0x278   :  { %v204_v60 = vmul.f32 0.6931472, %v399_v59 }
 0x27a   :  { %206 = vrot.lane.b32.xlu2 %v204_v60, %s448_s0 }
 0x2ce   :  { %v200_v61 = vpop.permute.xlu1 %199 }
 0x2cf   :  { %v202_v62 = vadd.f32 %v200_v61, %v475_v14 }
 0x2d4   :  { %v207_v63 = vpop.permute.xlu2 %206 }
 0x2d5   :  { %v209_v0 = vadd.f32 %v207_v63, %v202_v62 }
 0x2d7   :  { %v211_v1 = vrot.slane %v209_v0, 1 }
 0x2d9   :  { %v213_v2 = vmax.f32 %v209_v0, %v211_v1 }
 0x2db   :  { %v215_v3 = vrot.slane %v213_v2, 2 }
 0x2dd   :  { %v217_v4 = vmax.f32 %v213_v2, %v215_v3 }
 0x2df   :  { %v218_v5 = vmax.f32 %v217_v4, -1e+30 }
 0x2e1   :  { %v219_v6 = vperm.slane %v218_v5, 0 }
 0x2e3   :  { %235 = vrot.lane.b32.xlu0 %v219_v6, %s448_s0  ;;  %v220_v7 = vsub.f32 %v209_v0, %v219_v6 }
 0x2e5   :  { %v221_v8 = vmul.f32 1.442695, %v220_v7 }
 0x2e7   :  { %400 = vpow2.f32 %v221_v8 }
 0x2ed   :  { %v401_v9 = vpop.eup %400 }
 0x2ee   :  { %v223_v10 = vperm.slane %v401_v9, 0  ;;  %v225_v11 = vperm.slane %v401_v9, 1  ;;  %v228_v12 = vperm.slane %v401_v9, 2  ;;  %v231_v16 = vperm.slane %v401_v9, 3 }
 0x2f0   :  { %v224_v13 = vmul.f32 %v223_v10, %v479_v23  ;;  %v226_v15 = vmul.f32 %v225_v11, %v483_v27  ;;  %v229_v18 = vmul.f32 %v228_v12, %v481_v25  ;;  %v232_v20 = vmul.f32 %v231_v16, %v487_v34 }
 0x2f2   :  { %v227_v17 = vadd.f32 %v226_v15, %v224_v13 }
 0x2f4   :  { %v230_v19 = vadd.f32 %v229_v18, %v227_v17 }
 0x2f6   :  { %v233_v21 = vadd.f32 %v232_v20, %v230_v19 }
 0x2f8   :  { %402 = vlog2.f32 %v233_v21 }
 0x2fe   :  { %v403_v22 = vpop.eup %402 }
 0x2ff   :  { %v240_v24 = vmul.f32 0.6931472, %v403_v22 }
 0x301   :  { %242 = vrot.lane.b32.xlu1 %v240_v24, %s448_s0 }
 0x355   :  { %v236_v26 = vpop.permute.xlu0 %235 }
 0x356   :  { %v238_v28 = vadd.f32 %v236_v26, %v475_v14 }
 0x373   :  { %v243_v29 = vpop.permute.xlu1 %242 }
 0x374   :  { %v245_v30 = vadd.f32 %v243_v29, %v238_v28 }
 0x376   :  { %v247_v31 = vrot.slane %v245_v30, 1 }
 0x378   :  { %v249_v32 = vmax.f32 %v245_v30, %v247_v31 }
 0x37a   :  { %v251_v33 = vrot.slane %v249_v32, 2 }
 0x37c   :  { %v253_v35 = vmax.f32 %v249_v32, %v251_v33 }
 0x37e   :  { %v254_v36 = vmax.f32 %v253_v35, -1e+30 }
 0x380   :  { %v255_v37 = vperm.slane %v254_v36, 0 }
 0x382   :  { %271 = vrot.lane.b32.xlu2 %v255_v37, %s448_s0  ;;  %v256_v38 = vsub.f32 %v245_v30, %v255_v37 }
 0x384   :  { %v257_v39 = vmul.f32 1.442695, %v256_v38 }
 0x386   :  { %404 = vpow2.f32 %v257_v39 }
 0x38c   :  { %v405_v40 = vpop.eup %404 }
 0x38d   :  { %v259_v41 = vperm.slane %v405_v40, 0  ;;  %v261_v42 = vperm.slane %v405_v40, 1  ;;  %v264_v43 = vperm.slane %v405_v40, 2  ;;  %v267_v46 = vperm.slane %v405_v40, 3 }
 0x38f   :  { %v260_v44 = vmul.f32 %v259_v41, %v479_v23  ;;  %v262_v45 = vmul.f32 %v261_v42, %v483_v27  ;;  %v265_v48 = vmul.f32 %v264_v43, %v481_v25  ;;  %v268_v50 = vmul.f32 %v267_v46, %v487_v34 }
 0x391   :  { %v263_v47 = vadd.f32 %v262_v45, %v260_v44 }
 0x393   :  { %v266_v49 = vadd.f32 %v265_v48, %v263_v47 }
 0x395   :  { %v269_v51 = vadd.f32 %v268_v50, %v266_v49 }
 0x397   :  { %406 = vlog2.f32 %v269_v51 }
 0x39d   :  { %v407_v52 = vpop.eup %406 }
 0x39e   :  { %v276_v53 = vmul.f32 0.6931472, %v407_v52 }
 0x3a0   :  { %278 = vrot.lane.b32.xlu0 %v276_v53, %s448_s0 }
 0x3dc   :  { %v272_v54 = vpop.permute.xlu2 %271 }
 0x3dd   :  { %v274_v55 = vadd.f32 %v272_v54, %v475_v14 }
 0x412   :  { %v279_v56 = vpop.permute.xlu0 %278 }
 0x413   :  { %v281_v57 = vadd.f32 %v279_v56, %v274_v55 }
 0x415   :  { %v283_v58 = vrot.slane %v281_v57, 1 }
 0x417   :  { %v285_v59 = vmax.f32 %v281_v57, %v283_v58 }
 0x419   :  { %v287_v60 = vrot.slane %v285_v59, 2 }
 0x41b   :  { %v289_v61 = vmax.f32 %v285_v59, %v287_v60 }
 0x41d   :  { %v290_v62 = vmax.f32 %v289_v61, -1e+30 }
 0x41f   :  { %v291_v63 = vperm.slane %v290_v62, 0 }
 0x421   :  { %307 = vrot.lane.b32.xlu1 %v291_v63, %s448_s0  ;;  %v292_v0 = vsub.f32 %v281_v57, %v291_v63 }
 0x423   :  { %v293_v1 = vmul.f32 1.442695, %v292_v0 }
 0x425   :  { %408 = vpow2.f32 %v293_v1 }
 0x42b   :  { %v409_v2 = vpop.eup %408 }
 0x42c   :  { %v295_v3 = vperm.slane %v409_v2, 0  ;;  %v297_v4 = vperm.slane %v409_v2, 1  ;;  %v300_v5 = vperm.slane %v409_v2, 2  ;;  %v303_v8 = vperm.slane %v409_v2, 3 }
 0x42e   :  { %v296_v6 = vmul.f32 %v295_v3, %v479_v23  ;;  %v298_v7 = vmul.f32 %v297_v4, %v483_v27  ;;  %v301_v10 = vmul.f32 %v300_v5, %v481_v25  ;;  %v304_v12 = vmul.f32 %v303_v8, %v487_v34 }
 0x430   :  { %v299_v9 = vadd.f32 %v298_v7, %v296_v6 }
 0x432   :  { %v302_v11 = vadd.f32 %v301_v10, %v299_v9 }
 0x434   :  { %v305_v13 = vadd.f32 %v304_v12, %v302_v11 }
 0x436   :  { %410 = vlog2.f32 %v305_v13 }
 0x43c   :  { %v411_v15 = vpop.eup %410 }
 0x43d   :  { %v312_v16 = vmul.f32 0.6931472, %v411_v15 }
 0x43f   :  { %314 = vrot.lane.b32.xlu2 %v312_v16, %s448_s0 }
 0x493   :  { %v308_v17 = vpop.permute.xlu1 %307 }
 0x494   :  { %v310_v18 = vadd.f32 %v308_v17, %v475_v14 }
 0x499   :  { %v315_v19 = vpop.permute.xlu2 %314 }
 0x49a   :  { %v317_v23 = vadd.f32 %v315_v19, %v310_v18 }
 0x49c   :  { %v319_v20 = vrot.slane %v317_v23, 1 }
 0x49e   :  { %v321_v27 = vmax.f32 %v317_v23, %v319_v20 }
 0x4a0   :  { %v323_v21 = vrot.slane %v321_v27, 2 }
 0x4a2   :  { %v325_v22 = vmax.f32 %v321_v27, %v323_v21 }
 0x4a4   :  { %v326_v24 = vmax.f32 %v325_v22, -1e+30 }
 0x4a6   :  { %v327_v25 = vperm.slane %v326_v24, 0 }
 0x4a8   :  { %v328_v26 = vsub.f32 %v317_v23, %v327_v25 }
 0x4aa   :  { %v329_v28 = vmul.f32 1.442695, %v328_v26 }
 0x4ac   :  { %412 = vpow2.f32 %v329_v28 }
 0x4b2   :  { %v413_v34 = vpop.eup %412 }
 0x4b3   :  { %v332_v29 = vrot.slane %v413_v34, 1 }
 0x4b5   :  { %v334_v30 = vadd.f32 %v413_v34, %v332_v29 }
 0x4b7   :  { %v336_v31 = vrot.slane %v334_v30, 2 }
 0x4b9   :  { %v338_v32 = vadd.f32 %v336_v31, %v334_v30 }
 0x4bb   :  { %414 = vlog2.f32 %v338_v32 }
 0x4c1   :  { %v415_v33 = vpop.eup %414 }
 0x4c2   :  { %v340_v35 = vmul.f32 0.6931472, %v415_v33 }
 0x4c4   :  { %v341_v14 = vadd.f32 %v340_v35, %v326_v24 }
 0x4c6   :  { %343 = vrot.lane.b32.xlu0 %v341_v14, %s449_s1 }
 0x538   :  { %v344_v36 = vpop.permute.xlu0 %343 }
 0x539   :  { %v347_v37 = vsel %vm346_vm1, %v344_v36, 0.0 }
 0x53a   :  { %348 = vadd.xlane.f32.xlu1 %v347_v37 }
 0x5ad   :  { %v349_v38 = vpop.xlane.xlu1 %348 }
 0x5ae   :  { %351 = vst.msk [vmem:[#allocation2] sm:$0x1] %vm350_vm2, %v349_v38 }
 0x5af   :  { %362 = dma.vmem_to_hbm [thread:$0]  %s358_s16, 16, %s360_s19, [#allocation3]  }
 0x5b0   :  { %440 = dma.done.wait [#allocation3], 16  }
 0x5b1   :  { %441 = vsyncadd [#allocation3], 4294967280 }
 0x5b2   :  { %367 = vsyncpa [#allocation3], 1 }

</bundles_post_ra>
